<compile_context>
chip_gen: v5e
topology: v5e:2x2
jax: 0.10.0
libtpu: 0.0.40
codegen_flags: <defaults>
</compile_context>

<pallas_src>
import functools

import jax
import jax.numpy as jnp
from jax.experimental import pallas as pl
from jax.experimental.pallas import tpu as pltpu


def _round_up(x, m):
    return (x + m - 1) // m * m


# --------------------------------------------------------------------------
# Pass 1: Conv1d (im2col, single matmul) + per-channel sum / sumsq for BN.
# Grid: (N,).  Stats accumulate in a VMEM scratch across the (arbitrary) axis.
# --------------------------------------------------------------------------
def _conv_stats_kernel(x_ref, w_ref, y_ref, stats_ref, acc_ref, *,
                       K, Cin, Lout, stride, dilation, conv_dtype):
    n = pl.program_id(0)

    @pl.when(n == 0)
    def _init():
        acc_ref[...] = jnp.zeros_like(acc_ref)

    # im2col: stack the K dilated taps along the contraction axis -> one matmul
    # (contraction K*Cin instead of K matmuls with contraction Cin).
    taps = []
    for t in range(K):
        start = t * dilation
        if stride == 1:
            taps.append(x_ref[0, pl.ds(start, Lout), :])
        else:
            # TODO(synk): for stride > 1 a strided ref view (pl.ds(..., stride=stride))
            # would avoid materializing the contiguous span; kept portable here.
            span = (Lout - 1) * stride + 1
            xt = x_ref[0, pl.ds(start, span), :]
            taps.append(jax.lax.slice(xt, (0, 0), (span, Cin), (stride, 1)))
    xcat = jnp.concatenate(taps, axis=-1)                         # (Lout, K*Cin)

    y = jnp.dot(xcat.astype(conv_dtype), w_ref[...].astype(conv_dtype),
                preferred_element_type=jnp.float32)               # (Lout, Cout_pad)
    # NOTE: conv bias intentionally omitted — exactly cancelled by BN mean subtraction.
    y_ref[0] = y

    # Partial per-channel statistics for the global (batch) BN stats.
    s = jnp.sum(y, axis=0, keepdims=True)                         # (1, Cout_pad)
    ss = jnp.sum(y * y, axis=0, keepdims=True)                    # (1, Cout_pad)
    acc_ref[...] += jnp.concatenate([s, ss], axis=0)              # (2, Cout_pad)

    @pl.when(n == pl.num_programs(0) - 1)
    def _finalize():
        stats_ref[...] = acc_ref[...]


# --------------------------------------------------------------------------
# Pass 2: y * scale + shift (folded BN), ReLU, inverted dropout.
# Grid: (N,), fully parallel.
# --------------------------------------------------------------------------
def _bn_relu_dropout_kernel(*refs, use_dropout, threshold, inv_keep):
    if use_dropout:
        bits_ref, y_ref, scale_ref, shift_ref, o_ref = refs
    else:
        y_ref, scale_ref, shift_ref, o_ref = refs

    y = y_ref[0] * scale_ref[...] + shift_ref[...]       # (Lout, Cout_pad)
    y = jnp.maximum(y, 0.0)                              # ReLU

    if use_dropout:
        # integer-domain Bernoulli(keep = 1 - p): bits are uniform in [0, 2^31)
        keep = bits_ref[0] >= threshold
        y = jnp.where(keep, y * inv_keep, 0.0)

    o_ref[0] = y


# --------------------------------------------------------------------------
# Wrapper: PyTorch-layout in / out.
# --------------------------------------------------------------------------
def tcn_block_forward(x_ncl, weight, bias, gamma, beta, *, stride, dilation, p,
                      eps=1e-5, dropout_key=None, conv_dtype=jnp.float32):
    """x_ncl: (N, Cin, L) float32 (PyTorch Conv1d layout). Returns (N, Cout, Lout).

    conv_dtype: set to jnp.bfloat16 on v6e/v7x for the MXU matmul (f32 accumulate,
    f32 elementwise everywhere else).
    """
    N, Cin, L = x_ncl.shape
    Cout, _, K = weight.shape
    Lout = (L - dilation * (K - 1) - 1) // stride + 1
    assert Lout > 0
    Cp = _round_up(Cout, 128)          # lane-dense channel padding

    if p >= 1.0:                       # Dropout(p=1) zeros everything
        return jnp.zeros((N, Cout, Lout), jnp.float32)

    # ---- kernel-friendly layouts (channels-last, zero-padded channels) ----
    x_nlc = jnp.transpose(x_ncl, (0, 2, 1)).astype(jnp.float32)          # (N, L, Cin)
    w_kio = jnp.transpose(weight, (2, 1, 0)).astype(jnp.float32)         # (K, Cin, Cout)
    w_pad = jnp.zeros((K, Cin, Cp), jnp.float32).at[:, :, :Cout].set(w_kio)
    w2 = w_pad.reshape(K * Cin, Cp)                                      # im2col weights
    del bias                 # mathematically redundant under training-mode BN
    g_pad = jnp.zeros((Cp,), jnp.float32).at[:Cout].set(gamma.astype(jnp.float32))
    be_pad = jnp.zeros((Cp,), jnp.float32).at[:Cout].set(beta.astype(jnp.float32))

    # ---- pass 1: conv + BN batch statistics ----
    kern_a = functools.partial(_conv_stats_kernel, K=K, Cin=Cin, Lout=Lout,
                               stride=stride, dilation=dilation,
                               conv_dtype=conv_dtype)
    y_conv, stats = pl.pallas_call(
        kern_a,
        grid=(N,),
        in_specs=[
            pl.BlockSpec((1, L, Cin), lambda n: (n, 0, 0)),
            pl.BlockSpec((K * Cin, Cp), lambda n: (0, 0)),
        ],
        out_specs=(
            pl.BlockSpec((1, Lout, Cp), lambda n: (n, 0, 0)),
            pl.BlockSpec((2, Cp), lambda n: (0, 0)),
        ),
        out_shape=(
            jax.ShapeDtypeStruct((N, Lout, Cp), jnp.float32),
            jax.ShapeDtypeStruct((2, Cp), jnp.float32),
        ),
        scratch_shapes=[pltpu.VMEM((2, Cp), jnp.float32)],
        compiler_params=pltpu.CompilerParams(
            dimension_semantics=("arbitrary",)),
    )(x_nlc, w2)

    # ---- fold BN (training mode, biased variance) into per-channel scale/shift ----
    cnt = float(N * Lout)
    mean = stats[0] / cnt
    var = jnp.maximum(stats[1] / cnt - mean * mean, 0.0)
    inv_std = jax.lax.rsqrt(var + eps)
    scale = (g_pad * inv_std).reshape(1, Cp)
    shift = (be_pad - mean * g_pad * inv_std).reshape(1, Cp)

    # ---- pass 2: scale/shift + ReLU + dropout ----
    use_dropout = 0.0 < p < 1.0
    if use_dropout:
        # TODO(synk): torch's exact Dropout RNG stream is not reproducible; draw
        # bits with jax.random (outside the kernel) and threshold them in-kernel.
        if dropout_key is None:
            dropout_key = jax.random.PRNGKey(0)
        rbits = (jax.random.bits(dropout_key, (N, Lout, Cp), dtype=jnp.uint32)
                 >> 1).astype(jnp.int32)                    # uniform in [0, 2^31)
        threshold = min(int(round(p * float(1 << 31))), (1 << 31) - 1)
        inv_keep = 1.0 / (1.0 - p)
        args = (rbits, y_conv, scale, shift)
        in_specs = [
            pl.BlockSpec((1, Lout, Cp), lambda n: (n, 0, 0)),
            pl.BlockSpec((1, Lout, Cp), lambda n: (n, 0, 0)),
            pl.BlockSpec((1, Cp), lambda n: (0, 0)),
            pl.BlockSpec((1, Cp), lambda n: (0, 0)),
        ]
    else:
        threshold, inv_keep = 0, 1.0
        args = (y_conv, scale, shift)
        in_specs = [
            pl.BlockSpec((1, Lout, Cp), lambda n: (n, 0, 0)),
            pl.BlockSpec((1, Cp), lambda n: (0, 0)),
            pl.BlockSpec((1, Cp), lambda n: (0, 0)),
        ]

    kern_b = functools.partial(_bn_relu_dropout_kernel, use_dropout=use_dropout,
                               threshold=threshold, inv_keep=inv_keep)
    out_pad = pl.pallas_call(
        kern_b,
        grid=(N,),
        in_specs=in_specs,
        out_specs=pl.BlockSpec((1, Lout, Cp), lambda n: (n, 0, 0)),
        out_shape=jax.ShapeDtypeStruct((N, Lout, Cp), jnp.float32),
        compiler_params=pltpu.CompilerParams(
            dimension_semantics=("parallel",)),
    )(*args)

    # crop channel padding, back to PyTorch layout (N, Cout, Lout)
    return jnp.transpose(out_pad[:, :, :Cout], (0, 2, 1))


# --------------------------------------------------------------------------
# Pure-JAX reference (dropout = identity) for the correctness check.
# --------------------------------------------------------------------------
def _reference_no_dropout(x_ncl, weight, bias, gamma, beta, *, stride, dilation,
                          eps=1e-5):
    y = jax.lax.conv_general_dilated(
        x_ncl, weight, window_strides=(stride,), padding="VALID",
        rhs_dilation=(dilation,), dimension_numbers=("NCH", "OIH", "NCH"))
    y = y + bias[None, :, None]
    mean = jnp.mean(y, axis=(0, 2), keepdims=True)
    var = jnp.mean((y - mean) ** 2, axis=(0, 2), keepdims=True)
    y = gamma[None, :, None] * (y - mean) / jnp.sqrt(var + eps) + beta[None, :, None]
    return jnp.maximum(y, 0.0)


if __name__ == "__main__":
    # small shapes consistent with the module
    N, Cin, Cout, L = 2, 4, 8, 16
    K, stride, dilation, p = 3, 1, 2, 0.5

    key = jax.random.PRNGKey(0)
    kx, kw, kb, kd = jax.random.split(key, 4)

    # deterministic parameter init (Conv1d-style uniform fan-in bound)
    bound = 1.0 / (Cin * K) ** 0.5
    weight = jax.random.uniform(kw, (Cout, Cin, K), jnp.float32, -bound, bound)
    bias = jax.random.uniform(kb, (Cout,), jnp.float32, -bound, bound)
    gamma = jnp.ones((Cout,), jnp.float32)     # BatchNorm1d default init
    beta = jnp.zeros((Cout,), jnp.float32)

    x = jax.random.normal(kx, (N, Cin, L), jnp.float32)

    # correctness check with dropout disabled (deterministic path)
    out_check = tcn_block_forward(x, weight, bias, gamma, beta,
                                  stride=stride, dilation=dilation, p=0.0)
    ref = _reference_no_dropout(x, weight, bias, gamma, beta,
                                stride=stride, dilation=dilation)
    assert out_check.shape == ref.shape
    assert float(jnp.max(jnp.abs(out_check - ref))) < 1e-4

    # full forward (with dropout) as in the torch module's training forward
    out = tcn_block_forward(x, weight, bias, gamma, beta,
                            stride=stride, dilation=dilation, p=p,
                            dropout_key=kd)
    jax.block_until_ready(out)
    print("KERNEL_OK")
</pallas_src>

<mosaic_0001>
module attributes {stable_mosaic.version = 11 : i64} {
  func.func @_conv_stats_kernel(%arg0: i32, %arg1: memref<1x16x4xf32, #tpu.memory_space<vmem>>, %arg2: memref<12x128xf32, #tpu.memory_space<vmem>>, %arg3: memref<1x12x128xf32, #tpu.memory_space<vmem>>, %arg4: memref<2x128xf32, #tpu.memory_space<vmem>>, %arg5: memref<2x128xf32, #tpu.memory_space<vmem>>) attributes {dimension_semantics = [#tpu.dimension_semantics<arbitrary>], iteration_bounds = array<i64: 2>, scalar_prefetch = 0 : i64, scratch_operands = 1 : i64, tpu.core_type = #tpu.core_type<tc>, window_params = [{transform_indices = @transform_0, window_bounds = array<i64: 1, 16, 4>}, {pipeline_mode = #tpu.pipeline_mode<synchronous>, transform_indices = @transform_1, window_bounds = array<i64: 12, 128>}, {transform_indices = @transform_2, window_bounds = array<i64: 1, 12, 128>}, {pipeline_mode = #tpu.pipeline_mode<synchronous>, transform_indices = @transform_3, window_bounds = array<i64: 2, 128>}]} {
    %c0_i32 = arith.constant 0 : i32
    %0 = arith.cmpi eq, %arg0, %c0_i32 : i32
    %1 = arith.extui %0 : i1 to i32
    %c0_i32_0 = arith.constant 0 : i32
    %2 = arith.cmpi ne, %1, %c0_i32_0 : i32
    scf.if %2 {
      %cst_19 = arith.constant 0.000000e+00 : f32
      %27 = vector.broadcast %cst_19 : f32 to vector<2x128xf32>
      %c0_20 = arith.constant 0 : index
      %c0_21 = arith.constant 0 : index
      %28 = vector.load %arg5[%c0_20, %c0_21] : memref<2x128xf32, #tpu.memory_space<vmem>>, vector<2x128xf32>
      tpu.vector_store %arg5[%c0_20, %c0_21], %27 {strides = array<i32>} : memref<2x128xf32, #tpu.memory_space<vmem>>, vector<2x128xf32>,
    } else {
    }
    %c0 = arith.constant 0 : index
    %c0_1 = arith.constant 0 : index
    %c0_2 = arith.constant 0 : index
    %3 = vector.load %arg1[%c0, %c0_1, %c0_2] : memref<1x16x4xf32, #tpu.memory_space<vmem>>, vector<1x12x4xf32>
    %4 = vector.shape_cast %3 : vector<1x12x4xf32> to vector<12x4xf32>
    %c0_3 = arith.constant 0 : index
    %c2 = arith.constant 2 : index
    %c0_4 = arith.constant 0 : index
    %5 = vector.load %arg1[%c0_3, %c2, %c0_4] : memref<1x16x4xf32, #tpu.memory_space<vmem>>, vector<1x12x4xf32>
    %6 = vector.shape_cast %5 : vector<1x12x4xf32> to vector<12x4xf32>
    %c0_5 = arith.constant 0 : index
    %c4 = arith.constant 4 : index
    %c0_6 = arith.constant 0 : index
    %7 = vector.load %arg1[%c0_5, %c4, %c0_6] : memref<1x16x4xf32, #tpu.memory_space<vmem>>, vector<1x12x4xf32>
    %8 = vector.shape_cast %7 : vector<1x12x4xf32> to vector<12x4xf32>
    %9 = tpu.concatenate %4, %6, %8 in 1 : vector<12x4xf32>, vector<12x4xf32>, vector<12x4xf32> -> vector<12x12xf32>
    %c0_7 = arith.constant 0 : index
    %c0_8 = arith.constant 0 : index
    %10 = vector.load %arg2[%c0_7, %c0_8] : memref<12x128xf32, #tpu.memory_space<vmem>>, vector<12x128xf32>
    %cst = arith.constant dense<0.000000e+00> : vector<12x128xf32>
    %11 = tpu.matmul %9, %10, %cst {dimension_numbers = #tpu.dot_dimension_numbers<[1], [0], [0], [1], [0, 0, 1, 1], [], []>} : vector<12x12xf32>, vector<12x128xf32>, vector<12x128xf32> -> vector<12x128xf32>
    %c0_9 = arith.constant 0 : index
    %c0_10 = arith.constant 0 : index
    %c0_11 = arith.constant 0 : index
    %12 = vector.load %arg3[%c0_9, %c0_10, %c0_11] : memref<1x12x128xf32, #tpu.memory_space<vmem>>, vector<1x12x128xf32>
    %13 = vector.shape_cast %12 : vector<1x12x128xf32> to vector<12x128xf32>
    %14 = vector.shape_cast %11 : vector<12x128xf32> to vector<1x12x128xf32>
    tpu.vector_store %arg3[%c0_9, %c0_10, %c0_11], %14 {strides = array<i32>} : memref<1x12x128xf32, #tpu.memory_space<vmem>>, vector<1x12x128xf32>,
    %cst_12 = arith.constant dense<0.000000e+00> : vector<128xf32>
    %15 = vector.multi_reduction <add>, %11, %cst_12 [0] : vector<12x128xf32> to vector<128xf32>
    %16 = vector.shape_cast %15 : vector<128xf32> to vector<1x128xf32>
    %17 = arith.mulf %11, %11 : vector<12x128xf32>
    %cst_13 = arith.constant dense<0.000000e+00> : vector<128xf32>
    %18 = vector.multi_reduction <add>, %17, %cst_13 [0] : vector<12x128xf32> to vector<128xf32>
    %19 = vector.shape_cast %18 : vector<128xf32> to vector<1x128xf32>
    %c0_14 = arith.constant 0 : index
    %c0_15 = arith.constant 0 : index
    %20 = vector.load %arg5[%c0_14, %c0_15] : memref<2x128xf32, #tpu.memory_space<vmem>>, vector<2x128xf32>
    %21 = tpu.concatenate %16, %19 in 0 : vector<1x128xf32>, vector<1x128xf32> -> vector<2x128xf32>
    %22 = arith.addf %20, %21 : vector<2x128xf32>
    %c0_16 = arith.constant 0 : index
    %c0_17 = arith.constant 0 : index
    %23 = vector.load %arg5[%c0_16, %c0_17] : memref<2x128xf32, #tpu.memory_space<vmem>>, vector<2x128xf32>
    tpu.vector_store %arg5[%c0_16, %c0_17], %22 {strides = array<i32>} : memref<2x128xf32, #tpu.memory_space<vmem>>, vector<2x128xf32>,
    %c1_i32 = arith.constant 1 : i32
    %24 = arith.cmpi eq, %arg0, %c1_i32 : i32
    %25 = arith.extui %24 : i1 to i32
    %c0_i32_18 = arith.constant 0 : i32
    %26 = arith.cmpi ne, %25, %c0_i32_18 : i32
    scf.if %26 {
      %c0_19 = arith.constant 0 : index
      %c0_20 = arith.constant 0 : index
      %27 = vector.load %arg5[%c0_19, %c0_20] : memref<2x128xf32, #tpu.memory_space<vmem>>, vector<2x128xf32>
      %c0_21 = arith.constant 0 : index
      %c0_22 = arith.constant 0 : index
      %28 = vector.load %arg4[%c0_21, %c0_22] : memref<2x128xf32, #tpu.memory_space<vmem>>, vector<2x128xf32>
      tpu.vector_store %arg4[%c0_21, %c0_22], %27 {strides = array<i32>} : memref<2x128xf32, #tpu.memory_space<vmem>>, vector<2x128xf32>,
    } else {
    }
    return
  }
  func.func @transform_0(%arg0: i32) -> (i32, i32, i32) {
    %c0_i32 = arith.constant 0 : i32
    %c0_i32_0 = arith.constant 0 : i32
    %c0_i32_1 = arith.constant 0 : i32
    return %arg0, %c0_i32, %c0_i32_0 : i32, i32, i32
  }
  func.func @transform_1(%arg0: i32) -> (i32, i32) {
    %c0_i32 = arith.constant 0 : i32
    %c0_i32_0 = arith.constant 0 : i32
    %c0_i32_1 = arith.constant 0 : i32
    return %c0_i32, %c0_i32_0 : i32, i32
  }
  func.func @transform_2(%arg0: i32) -> (i32, i32, i32) {
    %c0_i32 = arith.constant 0 : i32
    %c0_i32_0 = arith.constant 0 : i32
    %c0_i32_1 = arith.constant 0 : i32
    return %arg0, %c0_i32, %c0_i32_0 : i32, i32, i32
  }
  func.func @transform_3(%arg0: i32) -> (i32, i32) {
    %c0_i32 = arith.constant 0 : i32
    %c0_i32_0 = arith.constant 0 : i32
    %c0_i32_1 = arith.constant 0 : i32
    return %c0_i32, %c0_i32_0 : i32, i32
  }
}

</mosaic_0001>

<bundles_post_ra>
// kernel: tpu_custom_call.1
= control target key start
LH: loop header
LB: loop body
LE: loop exit
PB: predicated region body
PF: predicated region fallthrough
CT: control target
= control target key end

     0   :  { %9 = vsyncpa [#allocation4], 0  ;;  %s455_s12 = smov 0   ;;  %s504_s0 = inlined_call_operand.vmem [shape: f32[2,16,4], index: 0, kind: input, shape index: {}]   ;;  %s505_s1 = inlined_call_operand.vmem [shape: f32[12,128], index: 1, kind: input, shape index: {}]   ;;  %s506_s2 = inlined_call_operand.vmem [shape: f32[2,12,128], index: 2, kind: output, shape index: {0}]   ;;  %s507_s3 = inlined_call_operand.hbm [shape: f32[2,128], index: 3, kind: output, shape index: {1}]  }
   0x1 LB: > { %s461_s13 = sadd.s32 4294967295, %s429_s12   ;;  %p355_p0 = scmp.ge.s32.totalorder %s429_s12, 1  ;;  %s429_s12 = sphi %s455_s12, %s15_s12  }
   0x2   : > { %p136_p1 = scmp.lt.s32.totalorder %s429_s12, 3 }
   0x4   : > { %p137_p2 = pnand %p355_p0, %p136_p1 }
   0x5   : > { %p160_p3 = scmp.lt.s32.totalorder (!%p137_p2), %s461_s13, 1  ;;  %p360_p4 = scmp.ne.s32.totalorder (!%p137_p2), %s461_s13, 0 }
   0x6   : > { %140 = sbr.rel (%p137_p2) target bundleno = 304 (0x130), region = 28 }
   0xb   : > { %s161_s14 = scalar_select %p160_p3, %s461_s13, 1 }
   0xc   : > { %173 = sbr.rel (%p360_p4) target bundleno = 19 (0x13), region = 32 }
   0xd   : > { %s369_s15 = sshll.u32 %s161_s14, 4 }
   0xe   : > { %s470_s18 = scalar_lea.vmem %s504_s0, %s369_s15  ;;  %s475_s21 = scalar_lea.vmem %s506_s2, %s369_s15 }
  0x11   : > { %v431_v0 = vmov 0.0  }
  0x12   : > { %174 = vst [vmem:[#allocation2] sm:$0x3] %v431_v0 }
  0x13 PF: > { %v178_v1 = vld [vmem:[%s470_s18 + $0xa] sm:$0xf]  ;;  %s432_s22 = smov 4   ;;  %s433_s23 = smov 8   ;;  %vm212_vm0 = vcmask 1043456   ;;  %v177_v4 = vld [vmem:[%s470_s18 + $0x2] sm:$0xff] }
  0x14   : > { %v180_v2 = vld [vmem:[%s470_s18 + $0xc] sm:$0xf]  ;;  %185 = vrot.lane.b32.xlu0 %v178_v1, %s432_s22  ;;  %v204_v3 = vld [vmem:[%s505_s1 + $0x8] sm:$0xf]  ;;  %v203_v6 = vld [vmem:[%s505_s1] sm:$0xff]  ;;  %vm197_vm1 = vcmask 31744  }
  0x15   : > { %193 = vrot.lane.b32.xlu1 %v180_v2, %s433_s23  ;;  %371 = vmatpush.msk.msra.mxu1 %vm212_vm0, %v204_v3  ;;  %v179_v5 = vld [vmem:[%s470_s18 + $0x4] sm:$0xff]  ;;  %vm200_vm2 = vcmask 64512   ;;  %vm205_vm3 = vcmask 97280   ;;  %vm260_vm4 = vcmask 1040384   ;;  %p364_p5 = scmp.ne.s32.totalorder %s461_s13, 1 }
  0x16   : > { %361 = vmatpush.msk.msra.mxu0 %vm212_vm0, %v204_v3  ;;  %v176_v7 = vld [vmem:[%s470_s18 + $0x8] sm:$0xf]  ;;  %v175_v12 = vld [vmem:[%s470_s18] sm:$0xff] }
  0x17   : > { %372 = vmatpush.msra.mxu1 %v203_v6 }
  0x18   : > { %231 = vmatpush.msra.mxu0 %v203_v6 }
  0x19   : > { %v259_v37 = vld [vmem:[#allocation2] sm:$0x3] }
  0x1c   : > { %183 = vrot.lane.b32.xlu0 %v177_v4, %s432_s22 }
  0x1d   : > { %191 = vrot.lane.b32.xlu1 %v179_v5, %s433_s23 }
  0x86   : > { %v186_v8 = vpop.permute.xlu0 %185 }
  0x87   : > { %v194_v9 = vpop.permute.xlu1 %193  ;;  %v199_v10 = vsel %vm197_vm1, %v176_v7, %v186_v8 }
  0x88   : > { %v202_v11 = vsel %vm200_vm2, %v199_v10, %v194_v9 }
  0x89   : > { %363 = vmatmul.msk.f32.vlgmr.msra.gmra.mxu1 %vm205_vm3, %v202_v11 }
  0x8e   : > { %v184_v13 = vpop.permute.xlu0 %183 }
  0x8f   : > { %v192_v14 = vpop.permute.xlu1 %191  ;;  %v198_v15 = vsel %vm197_vm1, %v175_v12, %v184_v13 }
  0x90   : > { %v201_v16 = vsel %vm200_vm2, %v198_v15, %v192_v14 }
  0x91   : > { %362 = vmatmul.msk.f32.vlgmr.msra.gmra.mxu0 %vm205_vm3, %v201_v16 }
 0x106   : > { %v236_v17 = vpop.f32.mrf.mxu1 }
 0x107   : > { %240 = vst [vmem:[%s475_s21 + $0x8] sm:$0xf] %v236_v17  ;;  %v250_v18 = vmul.f32 %v236_v17, %v236_v17  ;;  %v241_v19 = vsel %vm212_vm0, %v236_v17, 0.0 }
 0x109   : > { %v251_v23 = vsel %vm212_vm0, %v250_v18, 0.0 }
 0x10e   : > { %v233_v20 = vpop.f32.mrf.mxu0 }
 0x10f   : > { %239 = vst [vmem:[%s475_s21] sm:$0xff] %v233_v20  ;;  %v242_v21 = vadd.f32 %v241_v19, %v233_v20  ;;  %v249_v22 = vmul.f32 %v233_v20, %v233_v20 }
 0x111   : > { %v243_v24 = vrot.slane %v242_v21, 4  ;;  %v252_v25 = vadd.f32 %v251_v23, %v249_v22 }
 0x113   : > { %v244_v26 = vadd.f32 %v243_v24, %v242_v21  ;;  %v253_v27 = vrot.slane %v252_v25, 4 }
 0x115   : > { %v245_v28 = vrot.slane %v244_v26, 2  ;;  %v254_v29 = vadd.f32 %v253_v27, %v252_v25 }
 0x117   : > { %v246_v30 = vadd.f32 %v245_v28, %v244_v26  ;;  %v255_v31 = vrot.slane %v254_v29, 2 }
 0x119   : > { %v247_v32 = vrot.slane %v246_v30, 1  ;;  %v256_v33 = vadd.f32 %v255_v31, %v254_v29 }
 0x11b   : > { %v257_v34 = vrot.slane %v256_v33, 1  ;;  %v248_v35 = vadd.f32 %v247_v32, %v246_v30 }
 0x11d   : > { %v258_v36 = vadd.f32 %v257_v34, %v256_v33 }
 0x11e   : > { %267 = sbr.rel (%p364_p5) target bundleno = 299 (0x12b), region = 36 }
 0x11f   : > { %v261_v38 = vsel %vm260_vm4, %v248_v35, %v258_v36 }
 0x120   : > { %v262_v39 = vadd.f32 %v261_v38, %v259_v37 }
 0x122   : > { %263 = vst [vmem:[#allocation2] sm:$0x3] %v262_v39 }
 0x129   : > { %v268_v40 = vld [vmem:[#allocation2] sm:$0x3] }
 0x12a   : > { %269 = vst [vmem:[#allocation3] sm:$0x3] %v268_v40 }
 0x12b PF: > { %p377_p6 = scmp.eq.s32.totalorder %s461_s13, 1  ;;  %s434_s28 = smov [#allocation3]  }
 0x12c   : > { %s284_s29 = sshll.u32 %s434_s28, 4  ;;  %s286_s5 = sshll.u32 %s507_s3, 4  ;;  %s285_s29 = int_to_ptr.vmem [resolvable:$true] %s284_s29  ;;  %s287_s5 = int_to_ptr.hbm [resolvable:$true] %s286_s5 }
 0x12d   : > { %374 = dma.vmem_to_hbm [thread:$0]  (%p377_p6), %s285_s29, 32, %s287_s5, [#allocation4]  }
 0x12e   : > { %424 = dma.done.wait (%p377_p6), [#allocation4], 32  }
 0x12f   : > { %426 = vsyncadd (%p377_p6), [#allocation4], 4294967264 }
 0x130 PF: > { %s15_s12 = sadd.s32 1, %s429_s12  }
 0x131   : > { %p12_p7 = scmp.ge.s32.totalorder %s15_s12, 4  }
 0x133   :  { %14 = sbr.rel (!%p12_p7) target bundleno = 1 (0x1), region = 75 }
 0x138   :  { %308 = vsyncpa [#allocation4], 1 }
 0x139   :  { %310 = vsyncpa [#allocation4 + $0x1], 1 }

</bundles_post_ra>
